<compile_context>
chip_gen: v7x
topology: tpu7x:2x2x1
jax: 0.10.0
libtpu: 0.0.40
codegen_flags: <defaults>
</compile_context>

<pallas_src>
import jax
import jax.numpy as jnp
from jax.experimental import pallas as pl
from jax.experimental.pallas import tpu as pltpu


def _round_up(x, m):
    return ((x + m - 1) // m) * m


def _make_ce_tile_kernel(total_rows, tb):
    """Kernel computing the per-tile sum of row-wise CE NLL, with row masking."""

    def kernel(logits_ref, labels_ref, psum_ref):
        i = pl.program_id(0)

        logits = logits_ref[...]                                   # (tb, C), input dtype
        labels = labels_ref[...]                                   # (tb, 1), int32

        # Row max and target-logit pick in the input dtype (exact for bf16/f32).
        row_max = jnp.max(logits, axis=-1, keepdims=True)          # (tb, 1)
        col_ids = jax.lax.broadcasted_iota(jnp.int32, logits.shape, 1)
        picked = jnp.sum(
            jnp.where(col_ids == labels, logits, jnp.zeros((), logits.dtype)),
            axis=-1, keepdims=True)                                # (tb, 1)

        # Single full-tile f32 intermediate.
        row_max_f = row_max.astype(jnp.float32)
        shifted = logits.astype(jnp.float32) - row_max_f           # (tb, C) f32
        lse_shift = jnp.log(
            jnp.sum(jnp.exp(shifted), axis=-1, keepdims=True))     # (tb, 1)

        nll = lse_shift - (picked.astype(jnp.float32) - row_max_f)  # (tb, 1)

        # Mask rows past the true batch size (last partial tile reads undefined data
        # which can be NaN/inf after exp); zero them before the partial sum.
        row_ids = jax.lax.broadcasted_iota(jnp.int32, (tb, 1), 0) + i * tb
        nll = jnp.where(row_ids < total_rows, nll, 0.0)

        # Lane-dense, fully aligned (1, 8, 128) output block: one unmasked vreg store.
        psum_ref[...] = jnp.broadcast_to(jnp.sum(nll), (1, 8, 128))

    return kernel


def _plan_batch_tile(B, C, itemsize, vmem_budget_bytes):
    """Pick the batch tile size from a VMEM budget covering input bufs + f32 scratch."""
    sub = 8 * max(1, 4 // itemsize)                # sublane packing: 8 f32, 16 bf16, 32 int8
    # Double-buffered input tile + ~3 full-tile f32 intermediates per row of the tile.
    per_row_bytes = 2 * C * itemsize + 3 * C * 4
    tb = max(sub, (vmem_budget_bytes // max(per_row_bytes, 1)) // sub * sub)
    tb = min(tb, 32768)                            # keep sublane extent / index math sane
    # Prefer >= 4 grid steps when B allows it (v7x megacore via "parallel" semantics).
    tb = min(tb, max(sub, _round_up(pl.cdiv(B, 4), sub)))
    tb = min(tb, _round_up(B, sub))
    return tb


def cross_entropy_loss_pallas(logits, labels, *,
                              vmem_budget_bytes=24 * 1024 * 1024,
                              fast_path_bytes=256 * 1024,
                              force_pallas=False):
    """logits: [B, C] float (f32/bf16), labels: [B] int -> scalar f32 mean CE loss."""
    B, C = logits.shape
    itemsize = logits.dtype.itemsize

    # Fast path: for tiny problems the fixed pallas_call/pipeline overhead dominates.
    if not force_pallas and B * C * itemsize <= fast_path_bytes:
        logp = jax.nn.log_softmax(logits.astype(jnp.float32), axis=-1)
        picked = jnp.take_along_axis(
            logp, labels.astype(jnp.int32)[:, None], axis=-1)[:, 0]
        return -jnp.mean(picked)

    labels2d = labels.astype(jnp.int32).reshape(B, 1)

    tb = _plan_batch_tile(B, C, itemsize, vmem_budget_bytes)
    grid_n = pl.cdiv(B, tb)

    psums = pl.pallas_call(
        _make_ce_tile_kernel(B, tb),
        out_shape=jax.ShapeDtypeStruct((grid_n, 8, 128), jnp.float32),
        grid_spec=pltpu.PrefetchScalarGridSpec(
            num_scalar_prefetch=0,
            grid=(grid_n,),
            in_specs=[
                pl.BlockSpec((tb, C), lambda i: (i, 0)),   # logits tile (full C on lanes)
                pl.BlockSpec((tb, 1), lambda i: (i, 0)),   # labels tile
            ],
            out_specs=pl.BlockSpec((1, 8, 128), lambda i: (i, 0, 0)),  # per-tile partial sum
        ),
        compiler_params=pltpu.CompilerParams(
            dimension_semantics=("parallel",),   # independent tiles -> megacore on v7x
            vmem_limit_bytes=48 * 1024 * 1024,   # safe on v7x (64 MiB) and v5e/v6e (128 MiB)
        ),
    )(logits, labels2d)

    # Each (8,128) block holds the tile's partial sum broadcast; pick one lane per tile.
    return jnp.sum(psums[:, 0, 0]) / jnp.float32(B)


def base_dcnn_loss(x, y, **kwargs):
    """Mirror of baseDCNNLoss.forward: x is a sequence of model outputs, use x[0]."""
    return cross_entropy_loss_pallas(x[0], y, **kwargs)


if __name__ == "__main__":
    key = jax.random.PRNGKey(0)

    def ref_ce(logits, labels):
        lp = jax.nn.log_softmax(logits.astype(jnp.float32), axis=-1)
        return -jnp.mean(
            jnp.take_along_axis(lp, labels.astype(jnp.int32)[:, None], axis=-1)[:, 0])

    k1, k2, k3, k4, k5, k6 = jax.random.split(key, 6)

    # Case 1: module-sized demo (bsz=8, n_class=32), forced through the Pallas kernel.
    logits = jax.random.normal(k1, (8, 32), dtype=jnp.float32)
    labels = jax.random.randint(k2, (8,), 0, 32, dtype=jnp.int32)
    x = (logits,)                       # model returns a tuple; forward uses x[0]
    loss = jax.block_until_ready(base_dcnn_loss(x, labels, force_pallas=True))
    assert jnp.allclose(loss, ref_ce(logits, labels), atol=1e-5, rtol=1e-5), (
        loss, ref_ce(logits, labels))

    # Case 2: multi-tile grid (512 x 160 f32): natural Pallas path, 4 grid steps.
    logits2 = jax.random.normal(k3, (512, 160), dtype=jnp.float32)
    labels2 = jax.random.randint(k4, (512,), 0, 160, dtype=jnp.int32)
    loss2 = jax.block_until_ready(base_dcnn_loss((logits2,), labels2))
    assert jnp.allclose(loss2, ref_ce(logits2, labels2), atol=1e-5, rtol=1e-5), (
        loss2, ref_ce(logits2, labels2))

    # Case 3: bf16 logits + ragged batch (300 x 96): partial last tile + row masking.
    logits3 = jax.random.normal(k5, (300, 96), dtype=jnp.bfloat16)
    labels3 = jax.random.randint(k6, (300,), 0, 96, dtype=jnp.int32)
    loss3 = jax.block_until_ready(base_dcnn_loss((logits3,), labels3, force_pallas=True))
    assert jnp.allclose(loss3, ref_ce(logits3, labels3), atol=1e-4, rtol=1e-4), (
        loss3, ref_ce(logits3, labels3))

    print("KERNEL_OK")
</pallas_src>

<mosaic_0001>
module attributes {stable_mosaic.version = 11 : i64} {
  func.func @kernel(%arg0: i32, %arg1: memref<8x32xf32, #tpu.memory_space<vmem>>, %arg2: memref<8x1xi32, #tpu.memory_space<vmem>>, %arg3: memref<1x8x128xf32, #tpu.memory_space<vmem>>) attributes {dimension_semantics = [#tpu.dimension_semantics<parallel>], iteration_bounds = array<i64: 1>, scalar_prefetch = 0 : i64, scratch_operands = 0 : i64, tpu.core_type = #tpu.core_type<tc>, window_params = [{transform_indices = @transform_0, window_bounds = array<i64: 8, 32>}, {transform_indices = @transform_1, window_bounds = array<i64: 8, 1>}, {transform_indices = @transform_2, window_bounds = array<i64: 1, 8, 128>}]} {
    %c0 = arith.constant 0 : index
    %c0_0 = arith.constant 0 : index
    %0 = vector.load %arg1[%c0, %c0_0] : memref<8x32xf32, #tpu.memory_space<vmem>>, vector<8x32xf32>
    %c0_1 = arith.constant 0 : index
    %c0_2 = arith.constant 0 : index
    %1 = vector.load %arg2[%c0_1, %c0_2] : memref<8x1xi32, #tpu.memory_space<vmem>>, vector<8x1xi32>
    %cst = arith.constant dense<0xFF800000> : vector<8xf32>
    %2 = vector.multi_reduction <maximumf>, %0, %cst [1] : vector<8x32xf32> to vector<8xf32>
    %3 = vector.shape_cast %2 : vector<8xf32> to vector<8x1xf32>
    %4 = tpu.iota {dimensions = array<i32: 1>} : vector<8x32xi32>
    %5 = vector.broadcast %1 : vector<8x1xi32> to vector<8x32xi32>
    %6 = arith.cmpi eq, %4, %5 : vector<8x32xi32>
    %cst_3 = arith.constant 0.000000e+00 : f32
    %7 = vector.broadcast %cst_3 : f32 to vector<8x32xf32>
    %8 = arith.select %6, %0, %7 : vector<8x32xi1>, vector<8x32xf32>
    %cst_4 = arith.constant dense<0.000000e+00> : vector<8xf32>
    %9 = vector.multi_reduction <add>, %8, %cst_4 [1] : vector<8x32xf32> to vector<8xf32>
    %10 = vector.shape_cast %9 : vector<8xf32> to vector<8x1xf32>
    %11 = vector.broadcast %3 : vector<8x1xf32> to vector<8x32xf32>
    %12 = arith.subf %0, %11 : vector<8x32xf32>
    %13 = math.exp %12 : vector<8x32xf32>
    %cst_5 = arith.constant dense<0.000000e+00> : vector<8xf32>
    %14 = vector.multi_reduction <add>, %13, %cst_5 [1] : vector<8x32xf32> to vector<8xf32>
    %15 = vector.shape_cast %14 : vector<8xf32> to vector<8x1xf32>
    %16 = math.log %15 : vector<8x1xf32>
    %17 = arith.subf %10, %3 : vector<8x1xf32>
    %18 = arith.subf %16, %17 : vector<8x1xf32>
    %19 = tpu.iota {dimensions = array<i32: 0>} : vector<8x1xi32>
    %c8_i32 = arith.constant 8 : i32
    %20 = arith.muli %arg0, %c8_i32 : i32
    %21 = vector.broadcast %20 : i32 to vector<8x1xi32>
    %22 = arith.addi %19, %21 : vector<8x1xi32>
    %c8_i32_6 = arith.constant 8 : i32
    %23 = vector.broadcast %c8_i32_6 : i32 to vector<8x1xi32>
    %24 = arith.cmpi slt, %22, %23 : vector<8x1xi32>
    %cst_7 = arith.constant 0.000000e+00 : f32
    %25 = vector.broadcast %cst_7 : f32 to vector<8x1xf32>
    %26 = arith.select %24, %18, %25 : vector<8x1xi1>, vector<8x1xf32>
    %27 = vector.shape_cast %26 : vector<8x1xf32> to vector<1x8x1xf32>
    %cst_8 = arith.constant dense<0.000000e+00> : vector<1xf32>
    %28 = vector.multi_reduction <add>, %27, %cst_8 [1, 2] : vector<1x8x1xf32> to vector<1xf32>
    %29 = vector.shape_cast %28 : vector<1xf32> to vector<1x1x1xf32>
    %30 = vector.extract %29[0, 0, 0] : f32 from vector<1x1x1xf32>
    %31 = vector.broadcast %30 : f32 to vector<1x8x128xf32>
    %c0_9 = arith.constant 0 : index
    %c0_10 = arith.constant 0 : index
    %c0_11 = arith.constant 0 : index
    %32 = vector.load %arg3[%c0_9, %c0_10, %c0_11] : memref<1x8x128xf32, #tpu.memory_space<vmem>>, vector<1x8x128xf32>
    tpu.vector_store %arg3[%c0_9, %c0_10, %c0_11], %31 {strides = array<i32>} : memref<1x8x128xf32, #tpu.memory_space<vmem>>, vector<1x8x128xf32>,
    return
  }
  func.func @transform_0(%arg0: i32) -> (i32, i32) {
    %c0_i32 = arith.constant 0 : i32
    %c0_i32_0 = arith.constant 0 : i32
    return %arg0, %c0_i32 : i32, i32
  }
  func.func @transform_1(%arg0: i32) -> (i32, i32) {
    %c0_i32 = arith.constant 0 : i32
    %c0_i32_0 = arith.constant 0 : i32
    return %arg0, %c0_i32 : i32, i32
  }
  func.func @transform_2(%arg0: i32) -> (i32, i32, i32) {
    %c0_i32 = arith.constant 0 : i32
    %c0_i32_0 = arith.constant 0 : i32
    %c0_i32_1 = arith.constant 0 : i32
    return %arg0, %c0_i32, %c0_i32_0 : i32, i32, i32
  }
}

</mosaic_0001>

<bundles_post_ra>
// kernel: tpu_custom_call.1
= control target key start
LH: loop header
LB: loop body
LE: loop exit
PB: predicated region body
PF: predicated region fallthrough
CT: control target
= control target key end

     0   :  { %vm14_vm0 = vcmask 261120   ;;  %s143_s0 = inlined_call_operand.vmem [shape: f32[8,32], index: 0, kind: input, shape index: {}]   ;;  %s144_s1 = inlined_call_operand.vmem [shape: s32[8,1], index: 1, kind: input, shape index: {}]   ;;  %s145_s2 = inlined_call_operand.hbm [shape: f32[1,8,128], index: 2, kind: output, shape index: {}]  }
   0x1   :  { %v12_v0 = vld [vmem:[%s143_s0] sm:$0xff] }
   0x2   :  { %7 = vsyncpa [#allocation3], 0  ;;  %v15_v1 = vsel %vm14_vm0, %v12_v0, -inf  ;;  %v105_v2 = vmov 0   ;;  %v13_v3 = vld [vmem:[%s144_s1] sm:$0xff]  ;;  %v18_v7 = vlaneseq  ;;  %vm45_vm2 = vcmask 7168  }
   0x3   :  { %76 = vset.pattern.permute.xlu0 %v105_v2  ;;  %s106_s0 = smov [#allocation2]  }
   0x4   :  { %16 = vmax.xlane.f32.xlu0 %v15_v1  ;;  %v19_v8 = vand.u32 127, %v18_v7  ;;  %s64_s1 = sshll.u32 %s106_s0, 4  ;;  %s65_s1 = int_to_ptr.vmem [resolvable:$true] %s64_s1 }
   0x5   :  { %s81_s14 = scalar_lea.vmem %s65_s1, 128  ;;  %p86_p1 = scmp.lt.s32.totalorder %s65_s1, %s65_s1 }
   0x6   :  { %p82_p0 = scmp.ne.s32.totalorder %s65_s1, %s81_s14  ;;  %p87_p2 = scmp.lt.s32.totalorder %s81_s14, %s81_s14 }
   0x8   :  { %p88_p3 = por %p87_p2, %p86_p1 }
   0xa   :  { %p89_p4 = pnand %p88_p3, %p82_p0 }
  0x1a   :  { %21 = vperm.xlu0 %76, %v13_v3  }
  0x91   :  { %v17_v4 = vpop.xlane.xlu0 %16 }
  0x92   :  { %v28_v5 = vsub.f32 %v12_v0, %v17_v4 }
  0x94   :  { %v29_v6 = vmul.f32 1.442695, %v28_v5 }
  0x96   :  { %77 = vpow2.f32 %v29_v6 }
  0x99   :  { %v22_v9 = vpop.permute.xlu0 %21 }
  0x9a   :  { %vm23_vm1 = vcmp.eq.s32.totalorder %v19_v8, %v22_v9 }
  0x9b   :  { %v24_v11 = vsel %vm23_vm1, %v12_v0, 0.0 }
  0x9c   :  { %v25_v13 = vsel %vm14_vm0, %v24_v11, 0.0 }
  0xa0   :  { %v78_v10 = vpop.eup %77 }
  0xa1   :  { %v31_v12 = vsel %vm14_vm0, %v78_v10, 0.0 }
  0xa2   :  { %32 = vadd.xlane.f32.xlu1 %v31_v12 }
  0xa6   :  { %26 = vadd.xlane.f32.xlu1 %v25_v13 }
 0x12f   :  { %v33_v14 = vpop.xlane.xlu1 %32 }
 0x130   :  { %79 = vlog2.f32 %v33_v14 }
 0x133   :  { %v27_v15 = vpop.xlane.xlu1 %26 }
 0x134   :  { %v36_v18 = vsub.f32 %v27_v15, %v17_v4 }
 0x13a   :  { %v80_v16 = vpop.eup %79 }
 0x13b   :  { %v35_v17 = vmul.f32 0.6931472, %v80_v16 }
 0x13d   :  { %v37_v19 = vsub.f32 %v35_v17, %v36_v18 }
 0x13f   :  { %v46_v20 = vsel %vm45_vm2, %v37_v19, 0.0 }
 0x140   :  { %47 = vadd.xlane.f32.xlu1 %v46_v20 }
 0x1cd   :  { %v48_v21 = vpop.xlane.xlu1 %47 }
 0x1ce   :  { %v49_v22 = vrot.slane %v48_v21, 4 }
 0x1d0   :  { %v50_v23 = vadd.f32 %v49_v22, %v48_v21 }
 0x1d2   :  { %v51_v24 = vrot.slane %v50_v23, 2 }
 0x1d4   :  { %v52_v25 = vadd.f32 %v51_v24, %v50_v23 }
 0x1d6   :  { %v53_v26 = vrot.slane %v52_v25, 1 }
 0x1d8   :  { %v54_v27 = vadd.f32 %v53_v26, %v52_v25 }
 0x1da   :  { %72 = vpush %v54_v27 }
 0x20b   :  { %s73_s13 = spop %72 }
 0x20c   :  { %v56_v28 = vstv %s73_s13 }
 0x20d   :  { %57 = vst [vmem:[#allocation2] sm:$0xff] %v56_v28 }
 0x20e   :  { %92 = shalt.err (!%p89_p4)
}
 0x20f   :  { %s93_s17 = scalar_lea.hbm %s145_s2, 128 }
 0x210   :  { %p94_p5 = scmp.ne.s32.totalorder %s145_s2, %s93_s17  ;;  %p97_p6 = scmp.lt.u32.totalorder %s93_s17, %s145_s2 }
 0x212   :  { %p99_p7 = pnand %p97_p6, %p94_p5 }
 0x214   :  { %102 = shalt.err (!%p99_p7)
}
 0x215   :  { %67 = dma.vmem_to_hbm [thread:$0]  %s65_s1, 128, %s145_s2, [#allocation3]  }
 0x216   :  { %103 = dma.done.wait [#allocation3], 128  }
 0x217   :  { %104 = vsyncadd [#allocation3], 4294967168 }
 0x218   :  { %71 = vsyncpa [#allocation3], 1 }

</bundles_post_ra>
